<compile_context>
chip_gen: v7x
topology: tpu7x:2x2x1
jax: 0.10.0
libtpu: 0.0.40
codegen_flags: <defaults>
</compile_context>

<pallas_src>
import functools

import jax
import jax.numpy as jnp
from jax import lax
from jax.experimental import pallas as pl
from jax.experimental.pallas import tpu as pltpu


_TILE_TARGET_BYTES = 2 * 1024 * 1024   # ~2 MiB per main input block
_MAX_TILE_ROWS = 4096


def _windowed_sum(win, kernel_size, out_rows, off):
    """Sum of `kernel_size` consecutive rows of win (axis 1) for window starts
    off, off+1, ..., off+out_rows-1.  win: (1, P, C) float32."""
    if kernel_size <= 8:
        # Small windows: unrolled taps.
        acc = win[:, off:off + out_rows, :]
        for j in range(1, kernel_size):
            acc = acc + win[:, off + j:off + j + out_rows, :]
        return acc
    # Larger windows: log-step running sums (prefix-sum style doubling).
    pows = {1: win}
    d = 1
    while 2 * d <= kernel_size:
        prev = pows[d]
        n = prev.shape[1]
        pows[2 * d] = prev[:, :n - d, :] + prev[:, d:, :]
        d *= 2
    acc = None
    pos = off
    rem = kernel_size
    while rem > 0:
        if rem >= d:
            part = pows[d][:, pos:pos + out_rows, :]
            acc = part if acc is None else acc + part
            pos += d
            rem -= d
        d //= 2
    return acc


def _moving_avg_tiled_kernel(xm_ref, xl_ref, xr_ref, first_ref, last_ref, o_ref,
                             *, kernel_size, pad, seq_len, tile, halo):
    k = kernel_size
    ti = pl.program_id(1)
    t0 = ti * tile                         # first output row of this tile
    # Halo'd window: global input rows [t0 - halo, t0 + tile + halo).
    win = jnp.concatenate(
        [xl_ref[...], xm_ref[...], xr_ref[...]], axis=1).astype(jnp.float32)
    p = tile + 2 * halo
    # Zero rows whose global index is outside [0, seq_len): covers both the
    # padding region and garbage rows of partial/clamped edge blocks.
    g = (t0 - halo) + lax.broadcasted_iota(jnp.int32, (1, p, 1), 1)
    win = jnp.where((g >= 0) & (g < seq_len), win, 0.0)
    # Window of output row t starts at local row t + (halo - pad).
    s0 = _windowed_sum(win, k, tile, halo - pad)
    # Replicate padding: taps that fell before row 0 / after row L-1 contribute
    # x[:, 0] / x[:, L-1]; add them analytically.
    tglob = t0 + lax.broadcasted_iota(jnp.int32, (1, tile, 1), 1)
    n_left = jnp.clip(pad - tglob, 0, k).astype(jnp.float32)
    n_right = jnp.clip(tglob + (k - 1 - pad) - (seq_len - 1), 0, k).astype(jnp.float32)
    s = (s0
         + n_left * first_ref[...].astype(jnp.float32)
         + n_right * last_ref[...].astype(jnp.float32))
    o_ref[...] = (s * (1.0 / k)).astype(o_ref.dtype)


def _moving_avg_whole_kernel(x_ref, o_ref, *, kernel_size, pad, seq_len, out_rows):
    """Fallback for short sequences: one whole-sequence block per batch."""
    k = kernel_size
    x = x_ref[...].astype(jnp.float32)
    c = x.shape[2]
    rr = k - 1 - pad
    pieces = []
    if pad > 0:
        pieces.append(jnp.broadcast_to(x[:, 0:1, :], (1, pad, c)))
    pieces.append(x)
    if rr > 0:
        pieces.append(jnp.broadcast_to(x[:, seq_len - 1:seq_len, :], (1, rr, c)))
    win = pieces[0] if len(pieces) == 1 else jnp.concatenate(pieces, axis=1)
    s0 = _windowed_sum(win, k, out_rows, 0)
    o_ref[...] = (s0 * (1.0 / k)).astype(o_ref.dtype)


def _moving_avg_stride1(x, kernel_size, time_tile=None):
    """Stride-1 moving average with replicate padding.  x: (B, L, C)."""
    B, L, C = x.shape
    k = kernel_size
    pad = (k - 1) // 2
    rr = k - 1 - pad
    L1 = L + 2 * pad - k + 1
    assert L1 >= 1

    halo = 8 * pl.cdiv(max(pad, rr, 1), 8)     # halo rows, multiple of 8

    if time_tile is None:
        rows = max(halo, _TILE_TARGET_BYTES // max(1, C * x.dtype.itemsize))
        rows = min(rows, _MAX_TILE_ROWS)
    else:
        rows = max(halo, int(time_tile))
    tile = max(halo, (rows // halo) * halo)    # multiple of halo (hence of 8)

    if L1 <= tile:
        kernel = functools.partial(
            _moving_avg_whole_kernel, kernel_size=k, pad=pad,
            seq_len=L, out_rows=L1)
        return pl.pallas_call(
            kernel,
            out_shape=jax.ShapeDtypeStruct((B, L1, C), x.dtype),
            grid_spec=pltpu.PrefetchScalarGridSpec(
                num_scalar_prefetch=0,
                grid=(B,),
                in_specs=[pl.BlockSpec((1, L, C), lambda b: (b, 0, 0))],
                out_specs=pl.BlockSpec((1, L1, C), lambda b: (b, 0, 0))),
            compiler_params=pltpu.CompilerParams(
                dimension_semantics=("parallel",),
                vmem_limit_bytes=32 * 1024 * 1024),
        )(x)

    # Tiled path.
    nt = pl.cdiv(L1, tile)
    r = tile // halo                 # halo-blocks per main tile
    nbh = pl.cdiv(L, halo)           # number of halo-sized blocks along L

    first_row = x[:, :1, :]          # tiny (B, 1, C) arrays for the correction
    last_row = x[:, L - 1:, :]

    kernel = functools.partial(
        _moving_avg_tiled_kernel, kernel_size=k, pad=pad,
        seq_len=L, tile=tile, halo=halo)

    in_specs = [
        pl.BlockSpec((1, tile, C), lambda b, t: (b, t, 0)),                  # main rows
        pl.BlockSpec((1, halo, C),
                     lambda b, t: (b, jnp.maximum(t * r - 1, 0), 0)),        # left halo
        pl.BlockSpec((1, halo, C),
                     lambda b, t: (b, jnp.minimum((t + 1) * r, nbh - 1), 0)),  # right halo
        pl.BlockSpec((1, 1, C), lambda b, t: (b, 0, 0)),                     # x[:, 0]
        pl.BlockSpec((1, 1, C), lambda b, t: (b, 0, 0)),                     # x[:, L-1]
    ]
    return pl.pallas_call(
        kernel,
        out_shape=jax.ShapeDtypeStruct((B, L1, C), x.dtype),
        grid_spec=pltpu.PrefetchScalarGridSpec(
            num_scalar_prefetch=0,
            grid=(B, nt),
            in_specs=in_specs,
            out_specs=pl.BlockSpec((1, tile, C), lambda b, t: (b, t, 0))),
        compiler_params=pltpu.CompilerParams(
            dimension_semantics=("parallel", "parallel"),
            vmem_limit_bytes=32 * 1024 * 1024),
    )(x, x, x, first_row, last_row)


def moving_avg(x, kernel_size, stride=1, *, time_tile=None):
    """x: (B, L, C) -> (B, L_out, C), matching the PyTorch moving_avg module."""
    assert x.ndim == 3
    assert kernel_size >= 1 and stride >= 1
    full = _moving_avg_stride1(x, kernel_size, time_tile=time_tile)
    if stride == 1:
        return full
    # stride > 1: decimate the stride-1 result (cheap XLA slice in the wrapper)
    # instead of strided sublane slices inside the kernel.
    return full[:, ::stride, :]


def _reference(x, kernel_size, stride):
    """Pure-JAX reference mirroring the PyTorch forward."""
    pad = (kernel_size - 1) // 2
    front = jnp.repeat(x[:, :1, :], pad, axis=1)
    end = jnp.repeat(x[:, -1:, :], pad, axis=1)
    xp = jnp.concatenate([front, x, end], axis=1)
    L_pad = xp.shape[1]
    L_out = (L_pad - kernel_size) // stride + 1
    windows = jnp.stack(
        [xp[:, t * stride:t * stride + kernel_size, :] for t in range(L_out)],
        axis=1)
    return windows.mean(axis=2)


if __name__ == "__main__":
    key = jax.random.PRNGKey(0)
    configs = [
        # (B, L, C, kernel_size, stride, time_tile)
        (2, 64, 8, 25, 1, 16),    # tiled path, running-sum reduction, edge tiles
        (2, 64, 8, 5, 1, 16),     # tiled path, small-kernel unrolled taps
        (2, 16, 8, 25, 1, None),  # whole-sequence path, window spans both edges
        (2, 64, 8, 7, 2, 16),     # stride > 1 (decimated in the wrapper)
    ]
    for i, (B, L, C, k, s, tt) in enumerate(configs):
        key, sub = jax.random.split(key)
        x = jax.random.normal(sub, (B, L, C), dtype=jnp.float32)
        out = jax.block_until_ready(moving_avg(x, k, s, time_tile=tt))
        ref = _reference(x, k, s)
        assert out.shape == ref.shape, (i, out.shape, ref.shape)
        assert jnp.allclose(out, ref, atol=1e-5, rtol=1e-4), f"mismatch in config {i}"
    print("KERNEL_OK")
</pallas_src>

<mosaic_0001>
module attributes {stable_mosaic.version = 11 : i64} {
  func.func @_moving_avg_tiled_kernel(%arg0: i32, %arg1: i32, %arg2: memref<1x16x8xf32, #tpu.memory_space<vmem>>, %arg3: memref<1x16x8xf32, #tpu.memory_space<vmem>>, %arg4: memref<1x16x8xf32, #tpu.memory_space<vmem>>, %arg5: memref<1x1x8xf32, #tpu.memory_space<vmem>>, %arg6: memref<1x1x8xf32, #tpu.memory_space<vmem>>, %arg7: memref<1x16x8xf32, #tpu.memory_space<vmem>>) attributes {dimension_semantics = [#tpu.dimension_semantics<parallel>, #tpu.dimension_semantics<parallel>], iteration_bounds = array<i64: 2, 4>, scalar_prefetch = 0 : i64, scratch_operands = 0 : i64, tpu.core_type = #tpu.core_type<tc>, window_params = [{transform_indices = @transform_0, window_bounds = array<i64: 1, 16, 8>}, {transform_indices = @transform_1, window_bounds = array<i64: 1, 16, 8>}, {transform_indices = @transform_2, window_bounds = array<i64: 1, 16, 8>}, {transform_indices = @transform_3, window_bounds = array<i64: 1, 1, 8>}, {transform_indices = @transform_4, window_bounds = array<i64: 1, 1, 8>}, {transform_indices = @transform_5, window_bounds = array<i64: 1, 16, 8>}]} {
    %c16_i32 = arith.constant 16 : i32
    %0 = arith.muli %arg1, %c16_i32 : i32
    %c0 = arith.constant 0 : index
    %c0_0 = arith.constant 0 : index
    %c0_1 = arith.constant 0 : index
    %1 = vector.load %arg3[%c0, %c0_0, %c0_1] : memref<1x16x8xf32, #tpu.memory_space<vmem>>, vector<1x16x8xf32>
    %c0_2 = arith.constant 0 : index
    %c0_3 = arith.constant 0 : index
    %c0_4 = arith.constant 0 : index
    %2 = vector.load %arg2[%c0_2, %c0_3, %c0_4] : memref<1x16x8xf32, #tpu.memory_space<vmem>>, vector<1x16x8xf32>
    %c0_5 = arith.constant 0 : index
    %c0_6 = arith.constant 0 : index
    %c0_7 = arith.constant 0 : index
    %3 = vector.load %arg4[%c0_5, %c0_6, %c0_7] : memref<1x16x8xf32, #tpu.memory_space<vmem>>, vector<1x16x8xf32>
    %4 = tpu.concatenate %1, %2, %3 in 1 : vector<1x16x8xf32>, vector<1x16x8xf32>, vector<1x16x8xf32> -> vector<1x48x8xf32>
    %c16_i32_8 = arith.constant 16 : i32
    %5 = arith.subi %0, %c16_i32_8 : i32
    %6 = tpu.iota {dimensions = array<i32: 1>} : vector<1x48x1xi32>
    %7 = vector.broadcast %5 : i32 to vector<1x48x1xi32>
    %8 = arith.addi %7, %6 : vector<1x48x1xi32>
    %c0_i32 = arith.constant 0 : i32
    %9 = vector.broadcast %c0_i32 : i32 to vector<1x48x1xi32>
    %10 = arith.cmpi sge, %8, %9 : vector<1x48x1xi32>
    %c64_i32 = arith.constant 64 : i32
    %11 = vector.broadcast %c64_i32 : i32 to vector<1x48x1xi32>
    %12 = arith.cmpi slt, %8, %11 : vector<1x48x1xi32>
    %13 = arith.andi %10, %12 : vector<1x48x1xi1>
    %cst = arith.constant 0.000000e+00 : f32
    %14 = vector.shape_cast %13 : vector<1x48x1xi1> to vector<1x48x1xi1>
    %15 = vector.broadcast %14 : vector<1x48x1xi1> to vector<1x48x8xi1>
    %16 = vector.broadcast %cst : f32 to vector<1x48x8xf32>
    %17 = arith.select %15, %4, %16 : vector<1x48x8xi1>, vector<1x48x8xf32>
    %18 = vector.extract_strided_slice %17 {offsets = [0, 0, 0], sizes = [1, 47, 8], strides = [1, 1, 1]} : vector<1x48x8xf32> to vector<1x47x8xf32>
    %19 = vector.extract_strided_slice %17 {offsets = [0, 1, 0], sizes = [1, 47, 8], strides = [1, 1, 1]} : vector<1x48x8xf32> to vector<1x47x8xf32>
    %20 = arith.addf %18, %19 : vector<1x47x8xf32>
    %21 = vector.extract_strided_slice %20 {offsets = [0, 0, 0], sizes = [1, 45, 8], strides = [1, 1, 1]} : vector<1x47x8xf32> to vector<1x45x8xf32>
    %22 = vector.extract_strided_slice %20 {offsets = [0, 2, 0], sizes = [1, 45, 8], strides = [1, 1, 1]} : vector<1x47x8xf32> to vector<1x45x8xf32>
    %23 = arith.addf %21, %22 : vector<1x45x8xf32>
    %24 = vector.extract_strided_slice %23 {offsets = [0, 0, 0], sizes = [1, 41, 8], strides = [1, 1, 1]} : vector<1x45x8xf32> to vector<1x41x8xf32>
    %25 = vector.extract_strided_slice %23 {offsets = [0, 4, 0], sizes = [1, 41, 8], strides = [1, 1, 1]} : vector<1x45x8xf32> to vector<1x41x8xf32>
    %26 = arith.addf %24, %25 : vector<1x41x8xf32>
    %27 = vector.extract_strided_slice %26 {offsets = [0, 0, 0], sizes = [1, 33, 8], strides = [1, 1, 1]} : vector<1x41x8xf32> to vector<1x33x8xf32>
    %28 = vector.extract_strided_slice %26 {offsets = [0, 8, 0], sizes = [1, 33, 8], strides = [1, 1, 1]} : vector<1x41x8xf32> to vector<1x33x8xf32>
    %29 = arith.addf %27, %28 : vector<1x33x8xf32>
    %30 = vector.extract_strided_slice %29 {offsets = [0, 4, 0], sizes = [1, 16, 8], strides = [1, 1, 1]} : vector<1x33x8xf32> to vector<1x16x8xf32>
    %31 = vector.extract_strided_slice %26 {offsets = [0, 20, 0], sizes = [1, 16, 8], strides = [1, 1, 1]} : vector<1x41x8xf32> to vector<1x16x8xf32>
    %32 = arith.addf %30, %31 : vector<1x16x8xf32>
    %33 = vector.extract_strided_slice %17 {offsets = [0, 28, 0], sizes = [1, 16, 8], strides = [1, 1, 1]} : vector<1x48x8xf32> to vector<1x16x8xf32>
    %34 = arith.addf %32, %33 : vector<1x16x8xf32>
    %35 = tpu.iota {dimensions = array<i32: 1>} : vector<1x16x1xi32>
    %36 = vector.broadcast %0 : i32 to vector<1x16x1xi32>
    %37 = arith.addi %36, %35 : vector<1x16x1xi32>
    %c12_i32 = arith.constant 12 : i32
    %38 = vector.broadcast %c12_i32 : i32 to vector<1x16x1xi32>
    %39 = arith.subi %38, %37 : vector<1x16x1xi32>
    %c0_i32_9 = arith.constant 0 : i32
    %c25_i32 = arith.constant 25 : i32
    %40 = vector.broadcast %c0_i32_9 : i32 to vector<1x16x1xi32>
    %41 = arith.maxsi %40, %39 : vector<1x16x1xi32>
    %42 = vector.broadcast %c25_i32 : i32 to vector<1x16x1xi32>
    %43 = arith.minsi %42, %41 : vector<1x16x1xi32>
    %44 = arith.sitofp %43 : vector<1x16x1xi32> to vector<1x16x1xf32>
    %c12_i32_10 = arith.constant 12 : i32
    %45 = vector.broadcast %c12_i32_10 : i32 to vector<1x16x1xi32>
    %46 = arith.addi %37, %45 : vector<1x16x1xi32>
    %c63_i32 = arith.constant 63 : i32
    %47 = vector.broadcast %c63_i32 : i32 to vector<1x16x1xi32>
    %48 = arith.subi %46, %47 : vector<1x16x1xi32>
    %c0_i32_11 = arith.constant 0 : i32
    %c25_i32_12 = arith.constant 25 : i32
    %49 = vector.broadcast %c0_i32_11 : i32 to vector<1x16x1xi32>
    %50 = arith.maxsi %49, %48 : vector<1x16x1xi32>
    %51 = vector.broadcast %c25_i32_12 : i32 to vector<1x16x1xi32>
    %52 = arith.minsi %51, %50 : vector<1x16x1xi32>
    %53 = arith.sitofp %52 : vector<1x16x1xi32> to vector<1x16x1xf32>
    %c0_13 = arith.constant 0 : index
    %c0_14 = arith.constant 0 : index
    %c0_15 = arith.constant 0 : index
    %54 = vector.load %arg5[%c0_13, %c0_14, %c0_15] : memref<1x1x8xf32, #tpu.memory_space<vmem>>, vector<1x1x8xf32>
    %55 = vector.broadcast %44 : vector<1x16x1xf32> to vector<1x16x8xf32>
    %56 = vector.broadcast %54 : vector<1x1x8xf32> to vector<1x16x8xf32>
    %57 = arith.mulf %55, %56 : vector<1x16x8xf32>
    %58 = arith.addf %34, %57 : vector<1x16x8xf32>
    %c0_16 = arith.constant 0 : index
    %c0_17 = arith.constant 0 : index
    %c0_18 = arith.constant 0 : index
    %59 = vector.load %arg6[%c0_16, %c0_17, %c0_18] : memref<1x1x8xf32, #tpu.memory_space<vmem>>, vector<1x1x8xf32>
    %60 = vector.broadcast %53 : vector<1x16x1xf32> to vector<1x16x8xf32>
    %61 = vector.broadcast %59 : vector<1x1x8xf32> to vector<1x16x8xf32>
    %62 = arith.mulf %60, %61 : vector<1x16x8xf32>
    %63 = arith.addf %58, %62 : vector<1x16x8xf32>
    %cst_19 = arith.constant 4.000000e-02 : f32
    %64 = vector.broadcast %cst_19 : f32 to vector<1x16x8xf32>
    %65 = arith.mulf %63, %64 : vector<1x16x8xf32>
    %c0_20 = arith.constant 0 : index
    %c0_21 = arith.constant 0 : index
    %c0_22 = arith.constant 0 : index
    %66 = vector.load %arg7[%c0_20, %c0_21, %c0_22] : memref<1x16x8xf32, #tpu.memory_space<vmem>>, vector<1x16x8xf32>
    tpu.vector_store %arg7[%c0_20, %c0_21, %c0_22], %65 {strides = array<i32>} : memref<1x16x8xf32, #tpu.memory_space<vmem>>, vector<1x16x8xf32>,
    return
  }
  func.func @transform_0(%arg0: i32, %arg1: i32) -> (i32, i32, i32) {
    %c0_i32 = arith.constant 0 : i32
    %c0_i32_0 = arith.constant 0 : i32
    return %arg0, %arg1, %c0_i32 : i32, i32, i32
  }
  func.func @transform_1(%arg0: i32, %arg1: i32) -> (i32, i32, i32) {
    %c1_i32 = arith.constant 1 : i32
    %0 = arith.muli %arg1, %c1_i32 : i32
    %c1_i32_0 = arith.constant 1 : i32
    %1 = arith.subi %0, %c1_i32_0 : i32
    %c0_i32 = arith.constant 0 : i32
    %2 = arith.maxsi %1, %c0_i32 : i32
    %c0_i32_1 = arith.constant 0 : i32
    %c0_i32_2 = arith.constant 0 : i32
    return %arg0, %2, %c0_i32_1 : i32, i32, i32
  }
  func.func @transform_2(%arg0: i32, %arg1: i32) -> (i32, i32, i32) {
    %c1_i32 = arith.constant 1 : i32
    %0 = arith.addi %arg1, %c1_i32 : i32
    %c1_i32_0 = arith.constant 1 : i32
    %1 = arith.muli %0, %c1_i32_0 : i32
    %c3_i32 = arith.constant 3 : i32
    %2 = arith.minsi %1, %c3_i32 : i32
    %c0_i32 = arith.constant 0 : i32
    %c0_i32_1 = arith.constant 0 : i32
    return %arg0, %2, %c0_i32 : i32, i32, i32
  }
  func.func @transform_3(%arg0: i32, %arg1: i32) -> (i32, i32, i32) {
    %c0_i32 = arith.constant 0 : i32
    %c0_i32_0 = arith.constant 0 : i32
    %c0_i32_1 = arith.constant 0 : i32
    return %arg0, %c0_i32, %c0_i32_0 : i32, i32, i32
  }
  func.func @transform_4(%arg0: i32, %arg1: i32) -> (i32, i32, i32) {
    %c0_i32 = arith.constant 0 : i32
    %c0_i32_0 = arith.constant 0 : i32
    %c0_i32_1 = arith.constant 0 : i32
    return %arg0, %c0_i32, %c0_i32_0 : i32, i32, i32
  }
  func.func @transform_5(%arg0: i32, %arg1: i32) -> (i32, i32, i32) {
    %c0_i32 = arith.constant 0 : i32
    %c0_i32_0 = arith.constant 0 : i32
    return %arg0, %arg1, %c0_i32 : i32, i32, i32
  }
}

</mosaic_0001>

<bundles_post_ra>
// kernel: tpu_custom_call.1
= control target key start
LH: loop header
LB: loop body
LE: loop exit
PB: predicated region body
PF: predicated region fallthrough
CT: control target
= control target key end

     0   :  { %s921_s18 = smov 0   ;;  %s923_s19 = smov 0   ;;  %s1060_s0 = inlined_call_operand.vmem [shape: f32[2,64,8], index: 0, kind: input, shape index: {}]   ;;  %s1061_s1 = inlined_call_operand.vmem [shape: f32[2,64,8], index: 1, kind: input, shape index: {}]   ;;  %s1062_s2 = inlined_call_operand.vmem [shape: f32[2,64,8], index: 2, kind: input, shape index: {}]   ;;  %s1063_s3 = inlined_call_operand.vmem [shape: f32[2,1,8], index: 3, kind: input, shape index: {}]   ;;  %s1064_s4 = inlined_call_operand.vmem [shape: f32[2,1,8], index: 4, kind: input, shape index: {}]   ;;  %s1065_s5 = inlined_call_operand.vmem [shape: f32[2,64,8], index: 5, kind: output, shape index: {}]  }
   0x1   :  { %s925_s20 = smov 0   ;;  %s927_s21 = smov 0  }
   0x2   :  { %s929_s22 = smov 0  }
   0x3 LB: > { %s24_s23 = sadd.s32 1, %s881_s20  ;;  %s27_s24 = sadd.s32 1, %s885_s21  ;;  %s889_s22 = sphi %s929_s22, %s15_s22   ;;  %s885_s21 = sphi %s927_s21, %s1082_s21   ;;  %s881_s20 = sphi %s925_s20, %s1081_s20   ;;  %s877_s19 = sphi %s923_s19, %s1080_s19   ;;  %s873_s18 = sphi %s921_s18, %s1079_s18  }
   0x4   : > { %p25_p0 = scmp.ge.s32.totalorder %s24_s23, 4  ;;  %p789_p1 = scmp.ge.s32.totalorder %s889_s22, 1 }
   0x5   : > { %p282_p2 = scmp.lt.s32.totalorder %s889_s22, 9 }
   0x6   : > { %s1084_s23 = smov (%p25_p0, %s24_s23), 0  ;;  %s1086_s24 = smov (!%p25_p0, %s27_s24), %s885_s21 }
   0x7   : > { %p283_p3 = pnand %p789_p1, %p282_p2  ;;  %p29_p4 = scmp.ge.s32.totalorder %s1086_s24, 2 }
   0x8   : > { %s790_s25 = sshll.u32 (!%p283_p3), %s873_s18, 1  ;;  %p349_p5 = scmp.lt.s32.totalorder (!%p283_p3), %s877_s19, 1  ;;  %v414_v0 = vlaneseq (!%p283_p3)  ;;  %vm500_vm0 = vcmask (!%p283_p3), 1045504  }
   0x9   : > { %s1088_s24 = smov (%p29_p4, %s1086_s24), 0  ;;  %286 = sbr.rel (%p283_p3) target bundleno = 59 (0x3b), region = 40 }
   0xa   : > { %p351_p6 = scmp.lt.s32.totalorder (!%p283_p3), %s790_s25, 7  ;;  %s793_s26 = sadd.s32 (!%p283_p3), 4294967295, %s873_s18  ;;  %v415_v1 = vshrl.u32 (!%p283_p3), %v414_v0, 7 }
   0xb   : > { %p359_p7 = scmp.gt.s32.totalorder (!%p283_p3), %s793_s26, 0  ;;  %s374_s27 = sadd.s32 (!%p283_p3), 1, %s873_s18 }
   0xc   : > { %p375_p8 = scmp.lt.s32.totalorder (!%p283_p3), %s374_s27, 3  ;;  %s803_s8 = sshll.u32 (!%p283_p3), %s873_s18, 4  ;;  %v416_v2 = vadd.s32 (!%p283_p3), 8, %v415_v1  ;;  %v417_v3 = vadd.s32 (!%p283_p3), 16, %v415_v1  ;;  %v418_v4 = vadd.s32 (!%p283_p3), 24, %v415_v1  ;;  %v419_v6 = vadd.s32 (!%p283_p3), 32, %v415_v1 }
   0xd   : > { %v561_v5 = vstv (!%p283_p3), %s803_s8  ;;  %v420_v7 = vadd.s32 (!%p283_p3), 40, %v415_v1  ;;  %s804_s12 = sadd.s32 (!%p283_p3), 4294967280, %s803_s8 }
   0xe   : > { %v562_v8 = vadd.s32 (!%p283_p3), %v561_v5, %v415_v1  ;;  %v563_v9 = vadd.s32 (!%p283_p3), %v561_v5, %v416_v2  ;;  %v421_v10 = vstv (!%p283_p3), %s804_s12 }
   0xf   : > { %v422_v14 = vadd.s32 (!%p283_p3), %v421_v10, %v415_v1  ;;  %v423_v15 = vadd.s32 (!%p283_p3), %v421_v10, %v416_v2  ;;  %v424_v16 = vadd.s32 (!%p283_p3), %v421_v10, %v417_v3  ;;  %v425_v17 = vadd.s32 (!%p283_p3), %v421_v10, %v418_v4 }
  0x10   : > { %s1090_s19 = smov (!%p349_p5, %s877_s19), 1  ;;  %s1092_s25 = smov (!%p351_p6, %s790_s25), 7  ;;  %v564_v11 = vsub.s32 12, %v562_v8  ;;  %v565_v12 = vsub.s32 12, %v563_v9  ;;  %v576_v13 = vadd.s32 12, %v562_v8  ;;  %v426_v18 = vadd.s32 %v421_v10, %v419_v6 }
  0x11   : > { %s959_s28 = sshll.u32 %s1090_s19, 3  ;;  %s1094_s26 = smov (!%p359_p7, %s793_s26), 0  ;;  %v427_v19 = vadd.s32 %v421_v10, %v420_v7  ;;  %vm428_vm3 = vcmp.ge.s32.totalorder %v422_v14, 0  ;;  %vm429_vm4 = vcmp.ge.s32.totalorder %v423_v15, 0  ;;  %vm430_vm5 = vcmp.ge.s32.totalorder %v424_v16, 0 }
  0x12   : > { %s1096_s27 = smov (!%p375_p8, %s374_s27), 3  ;;  %s794_s29 = sshll.u32 %s1094_s26, 1  ;;  %vm974_vm1 = vcmp.gt.s32.totalorder %v564_v11, 0  ;;  %vm978_vm2 = vcmp.gt.s32.totalorder %v565_v12, 0  ;;  %vm434_vm9 = vcmp.lt.s32.totalorder %v422_v14, 64  ;;  %vm435_vm10 = vcmp.lt.s32.totalorder %v423_v15, 64 }
  0x13   : > { %p364_p9 = scmp.lt.s32.totalorder %s794_s29, 7  ;;  %s797_s30 = sshll.u32 %s1096_s27, 1  ;;  %vm436_vm11 = vcmp.lt.s32.totalorder %v424_v16, 64  ;;  %vm437_vm12 = vcmp.lt.s32.totalorder %v425_v17, 64  ;;  %vm438_vm13 = vcmp.lt.s32.totalorder %v426_v18, 64  ;;  %vm440_vm15 = vmand %vm428_vm3, %vm434_vm9  ;;  %v567_v27 = vsel %vm974_vm1, %v564_v11, 0 }
  0x14   : > { %s354_s6 = sadd.s32 %s959_s28, %s1092_s25  ;;  %p380_p10 = scmp.lt.s32.totalorder %s797_s30, 7  ;;  %vm441_vm6 = vmand %vm429_vm4, %vm435_vm10  ;;  %v569_v28 = vsel %vm978_vm2, %v565_v12, 0  ;;  %v577_v29 = vadd.s32 12, %v563_v9  ;;  %vm570_vm14 = vcmp.lt.s32.totalorder %v567_v27, 25  ;;  %vm1070_vm3 = vcmp.ge.s32.totalorder %v425_v17, 0 }
  0x15   : > { %s1098_s29 = smov (!%p364_p9, %s794_s29), 7  ;;  %s965_s11 = sshll.u32 %s354_s6, 3  ;;  %vm442_vm8 = vmand %vm430_vm5, %vm436_vm11  ;;  %vm572_vm7 = vcmp.lt.s32.totalorder %v569_v28, 25  ;;  %v571_v36 = vsel %vm570_vm14, %v567_v27, 25  ;;  %vm1071_vm1 = vcmp.ge.s32.totalorder %v426_v18, 0  ;;  %vm1072_vm4 = vcmp.lt.s32.totalorder %v427_v19, 64 }
  0x16   : > { %s1100_s30 = smov (!%p380_p10, %s797_s30), 7  ;;  %s367_s7 = sadd.s32 %s959_s28, %s1098_s29  ;;  %vm443_vm9 = vmand %vm1070_vm3, %vm437_vm12  ;;  %v994_v37 = vsel %vm572_vm7, %v569_v28, 25  ;;  %v574_v40 = vcvt.s32.f32 %v571_v36  ;;  %vm1073_vm5 = vcmp.ge.s32.totalorder %v427_v19, 0  ;;  %vm1074_vm10 = vcmask 1046528  }
  0x17   : > { %s796_s9 = sshll.u32 %s367_s7, 3  ;;  %s383_s10 = sadd.s32 %s959_s28, %s1100_s30  ;;  %vm444_vm2 = vmand %vm1071_vm1, %vm438_vm13  ;;  %v575_v41 = vcvt.s32.f32 %v994_v37  ;;  %v805_v45 = vadd.s32 4294967233, %v576_v13  ;;  %v806_v53 = vadd.s32 4294967233, %v577_v29  ;;  %vm635_vm1 = vcmask 64512  }
  0x18   : > { %s369_s15 = scalar_lea.vmem %s1061_s1, %s796_s9  ;;  %s799_s16 = sshll.u32 %s383_s10, 3  ;;  %vm1075_vm7 = vmmov %vm1074_vm10 }
  0x19   : > { %s356_s25 = scalar_lea.vmem %s1060_s0, %s965_s11  ;;  %v407_v22 = vld [vmem:[%s369_s15] sm:$0xff]  ;;  %s385_s28 = scalar_lea.vmem %s1062_s2, %s799_s16  ;;  %v408_v23 = vld [vmem:[%s369_s15 + $0x8] sm:$0xff]  ;;  %vm1076_vm11 = vmmov %vm1075_vm7  ;;  %vm580_vm13 = vcmp.gt.s32.totalorder %v805_v45, 0 }
  0x1a   : > { %v409_v24 = vld [vmem:[%s356_s25] sm:$0xff]  ;;  %v410_v25 = vld [vmem:[%s356_s25 + $0x8] sm:$0xff]  ;;  %v458_v26 = vsel %vm440_vm15, %v407_v22, 0.0  ;;  %v459_v31 = vsel %vm441_vm6, %v408_v23, 0.0  ;;  %vm445_vm6 = vmand %vm1073_vm5, %vm1072_vm4  ;;  %s392_s6 = scalar_lea.vmem %s1063_s3, %s1090_s19  ;;  %v581_v63 = vsel %vm580_vm13, %v805_v45, 0  ;;  %vm582_vm15 = vcmp.gt.s32.totalorder %v806_v53, 0  ;;  %s395_s9 = scalar_lea.vmem %s1064_s4, %s1090_s19 }
  0x1b   : > { %v411_v30 = vld [vmem:[%s385_s28] sm:$0xff]  ;;  %v471_v32 = vrot.slane %v458_v26, 1  ;;  %v412_v33 = vld [vmem:[%s385_s28 + $0x8] sm:$0xff]  ;;  %v460_v34 = vsel %vm442_vm8, %v409_v24, 0.0  ;;  %v472_v35 = vrot.slane %v459_v31, 1  ;;  %v998_v38 = vsel %vm443_vm9, %v410_v25, 0.0  ;;  %vm1077_vm12 = vmmov %vm1075_vm7  ;;  %s404_s12 = scalar_lea.vmem %s1065_s5, %s965_s11 }
  0x1c   : > { %v474_v39 = vrot.slane %v460_v34, 1  ;;  %v1003_v42 = vsel %vm444_vm2, %v411_v30, 0.0  ;;  %v476_v44 = vrot.slane %v998_v38, 1  ;;  %v1007_v46 = vsel %vm445_vm6, %v412_v33, 0.0  ;;  %vm1078_vm14 = vmmov %vm1075_vm7  ;;  %v807_v11 = vld [vmem:[%s392_s6] ss:$0 sm:$0xff] }
  0x1d   : > { %v473_v43 = vsel %vm1074_vm10, %v471_v32, %v472_v35  ;;  %v478_v48 = vrot.slane %v1003_v42, 1  ;;  %vm530_vm8 = vcmask 1043456   ;;  %v480_v51 = vrot.slane %v1007_v46, 1 }
  0x1e   : > { %v475_v47 = vsel %vm1075_vm7, %v472_v35, %v474_v39  ;;  %v488_v49 = vadd.f32 %v473_v43, %v458_v26  ;;  %v477_v50 = vsel %vm1076_vm11, %v474_v39, %v476_v44  ;;  %v583_v3 = vsel %vm582_vm15, %v806_v53, 0 }
  0x1f   : > { %v489_v52 = vadd.f32 %v475_v47, %v459_v31  ;;  %v479_v54 = vsel %vm1077_vm12, %v476_v44, %v478_v48  ;;  %v490_v55 = vadd.f32 %v477_v50, %v460_v34  ;;  %v481_v57 = vsel %vm1078_vm14, %v478_v48, %v480_v51  ;;  %v808_v31 = vld [vmem:[%s395_s9] ss:$0 sm:$0xff] }
  0x20   : > { %v501_v56 = vrot.slane %v488_v49, 2  ;;  %v491_v58 = vadd.f32 %v479_v54, %v998_v38  ;;  %v493_v59 = vadd.f32 %v480_v51, %v1007_v46  ;;  %v492_v61 = vadd.f32 %v481_v57, %v1003_v42 }
  0x21   : > { %v502_v60 = vrot.slane %v489_v52, 2  ;;  %v504_v62 = vrot.slane %v490_v55, 2  ;;  %vm584_vm3 = vcmp.lt.s32.totalorder %v581_v63, 25  ;;  %vm586_vm9 = vcmp.lt.s32.totalorder %v583_v3, 25 }
  0x22   : > { %v506_v1 = vrot.slane %v491_v58, 2  ;;  %v510_v2 = vrot.slane %v493_v59, 2  ;;  %v508_v5 = vrot.slane %v492_v61, 2  ;;  %v585_v10 = vsel %vm584_vm3, %v581_v63, 25 }
  0x23   : > { %v503_v0 = vsel %vm500_vm0, %v501_v56, %v502_v60  ;;  %v505_v4 = vsel %vm500_vm0, %v502_v60, %v504_v62  ;;  %v588_v21 = vcvt.s32.f32 %v585_v10  ;;  %v597_v22 = vmul.f32 %v807_v11, %v574_v40 }
  0x24   : > { %v518_v6 = vadd.f32 %v503_v0, %v488_v49  ;;  %v507_v7 = vsel %vm500_vm0, %v504_v62, %v506_v1  ;;  %v519_v8 = vadd.f32 %v505_v4, %v489_v52  ;;  %v523_v9 = vadd.f32 %v510_v2, %v493_v59 }
  0x25   : > { %v509_v12 = vsel %vm500_vm0, %v506_v1, %v508_v5  ;;  %v511_v13 = vsel %vm500_vm0, %v508_v5, %v510_v2  ;;  %v520_v14 = vadd.f32 %v507_v7, %v490_v55  ;;  %v587_v26 = vsel %vm586_vm9, %v583_v3, 25 }
  0x26   : > { %v531_v15 = vrot.slane %v518_v6, 4  ;;  %v521_v16 = vadd.f32 %v509_v12, %v491_v58  ;;  %v522_v17 = vadd.f32 %v511_v13, %v492_v61  ;;  %v532_v18 = vrot.slane %v519_v8, 4 }
  0x27   : > { %v540_v19 = vrot.slane %v523_v9, 4  ;;  %v534_v20 = vrot.slane %v520_v14, 4  ;;  %v589_v29 = vcvt.s32.f32 %v587_v26  ;;  %v598_v30 = vmul.f32 %v807_v11, %v575_v41 }
  0x28   : > { %v533_v23 = vsel %vm530_vm8, %v531_v15, %v532_v18  ;;  %v536_v24 = vrot.slane %v521_v16, 4  ;;  %v538_v25 = vrot.slane %v522_v17, 4  ;;  %v601_v40 = vrot.slane %v597_v22, 4 }
  0x29   : > { %v535_v27 = vsel %vm530_vm8, %v532_v18, %v534_v20  ;;  %v547_v28 = vadd.f32 %v533_v23, %v518_v6  ;;  %v602_v44 = vrot.slane %v598_v30, 4  ;;  %v617_v45 = vmul.f32 %v808_v31, %v588_v21 }
  0x2a   : > { %v537_v32 = vsel %vm530_vm8, %v534_v20, %v536_v24  ;;  %v539_v33 = vsel %vm530_vm8, %v536_v24, %v538_v25  ;;  %v541_v34 = vsel %vm530_vm8, %v538_v25, %v540_v19  ;;  %v548_v35 = vadd.f32 %v535_v27, %v519_v8 }
  0x2b   : > { %v549_v36 = vadd.f32 %v537_v32, %v520_v14  ;;  %v550_v37 = vadd.f32 %v539_v33, %v521_v16  ;;  %v551_v39 = vadd.f32 %v541_v34, %v522_v17  ;;  %v618_v47 = vmul.f32 %v808_v31, %v589_v29 }
  0x2c   : > { %v552_v43 = vadd.f32 %v548_v35, %v547_v28  ;;  %v621_v50 = vrot.slane %v617_v45, 4  ;;  %v603_v55 = vsel %vm530_vm8, %v601_v40, %v602_v44  ;;  %vm633_vm0 = vcmask 64516  }
  0x2d   : > { %v553_v48 = vadd.f32 %v549_v36, %v548_v35  ;;  %v554_v49 = vadd.f32 %v550_v37, %v549_v36  ;;  %v622_v51 = vrot.slane %v618_v47, 4  ;;  %vm637_vm2 = vcmask 60416  }
  0x2e   : > { %v555_v41 = vadd.f32 %v552_v43, %v549_v36 }
  0x2f   : > { %v556_v52 = vadd.f32 %v553_v48, %v550_v37  ;;  %v557_v53 = vadd.f32 %v554_v49, %v551_v39  ;;  %v623_v59 = vsel %vm530_vm8, %v621_v50, %v622_v51 }
  0x30   : > { %v558_v54 = vadd.f32 %v555_v41, %v998_v38 }
  0x31   : > { %v559_v56 = vadd.f32 %v556_v52, %v1003_v42  ;;  %v560_v57 = vadd.f32 %v557_v53, %v1007_v46 }
  0x32   : > { %v607_v58 = vadd.f32 %v601_v40, %v558_v54 }
  0x33   : > { %v608_v60 = vadd.f32 %v603_v55, %v559_v56  ;;  %v609_v61 = vadd.f32 %v602_v44, %v560_v57 }
  0x34   : > { %v627_v62 = vadd.f32 %v621_v50, %v607_v58 }
  0x35   : > { %v628_v63 = vadd.f32 %v623_v59, %v608_v60  ;;  %v629_v0 = vadd.f32 %v622_v51, %v609_v61 }
  0x36   : > { %v630_v38 = vmul.f32 0.04, %v627_v62 }
  0x37   : > { %v631_v1 = vmul.f32 0.04, %v628_v63  ;;  %v632_v42 = vmul.f32 0.04, %v629_v0 }
  0x38   : > { %634 = vst.msk [vmem:[%s404_s12 - $0x4] sm:$0xf0] %vm633_vm0, %v630_v38 }
  0x39   : > { %636 = vst.msk [vmem:[%s404_s12 + $0x4] sm:$0xff] %vm635_vm1, %v631_v1 }
  0x3a   : > { %638 = vst.msk [vmem:[%s404_s12 + $0xc] sm:$0xf] %vm637_vm2, %v632_v42 }
  0x3b PF: > { %s15_s22 = sadd.s32 1, %s889_s22   ;;  %s1079_s18 = smov %s881_s20 }
  0x3c   : > { %p12_p11 = scmp.ge.s32.totalorder %s15_s22, 10   ;;  %s1080_s19 = smov %s885_s21 }
  0x3d   : > { %s1081_s20 = smov %s1084_s23  ;;  %s1082_s21 = smov %s1088_s24 }
  0x3e   :  { %14 = sbr.rel (!%p12_p11) target bundleno = 3 (0x3), region = 82 }

</bundles_post_ra>
